<compile_context>
chip_gen: v7x
topology: tpu7x:2x2x1
jax: 0.10.0
libtpu: 0.0.40
codegen_flags: <defaults>
</compile_context>

<pallas_src>
import math

import jax
import jax.numpy as jnp
from jax.experimental import pallas as pl
from jax.experimental.pallas import tpu as pltpu


# ----------------------------- fused Pallas kernels -------------------------

def _matmul_bn_relu_kernel(x_ref, w_ref, p_ref, pt_ref, g_ref, b_ref, o_ref):
    """One deconv block: im2col matmul + training-mode BatchNorm + ReLU.

    x : (M, K)    im2col rows (pixels) x input features
    w : (K, GC)   GC = group * C output columns (group = spatial taps/phases)
    p : (GC, C)   0/1 matrix summing the `group` columns belonging to a channel
    pt: (C, GC)   p^T (broadcasts per-channel scale/shift back to GC columns)
    g,b: (1, C)   BatchNorm gamma / beta
    o : (M, GC)
    """
    # MXU matmul in bf16 (native on v5e/v6e/v7x), fp32 accumulation.
    y = jnp.dot(x_ref[...].astype(jnp.bfloat16),
                w_ref[...].astype(jnp.bfloat16),
                preferred_element_type=jnp.float32)                # (M, GC)
    m_rows, gc = y.shape
    c = pt_ref.shape[0]
    cnt = float(m_rows * (gc // c))
    # Batch statistics per channel: reduce over pixel rows, then over the phase
    # column-groups via a tiny 0/1 matmul (no in-kernel lane slicing needed).
    s1 = jnp.sum(y, axis=0, keepdims=True)                         # (1, GC)
    s2 = jnp.sum(y * y, axis=0, keepdims=True)                     # (1, GC)
    mean = jnp.dot(s1, p_ref[...], preferred_element_type=jnp.float32) / cnt
    ex2 = jnp.dot(s2, p_ref[...], preferred_element_type=jnp.float32) / cnt
    var = ex2 - mean * mean                                        # biased (BN train)
    scale = g_ref[...] * jax.lax.rsqrt(var + 1e-5)                 # (1, C)
    shift = b_ref[...] - mean * scale                              # (1, C)
    scale_gc = jnp.dot(scale, pt_ref[...], preferred_element_type=jnp.float32)
    shift_gc = jnp.dot(shift, pt_ref[...], preferred_element_type=jnp.float32)
    o_ref[...] = jnp.maximum(y * scale_gc + shift_gc, 0.0)


def _matmul_bias_tanh_kernel(x_ref, w_ref, b_ref, o_ref):
    y = jnp.dot(x_ref[...].astype(jnp.bfloat16),
                w_ref[...].astype(jnp.bfloat16),
                preferred_element_type=jnp.float32)
    o_ref[...] = jnp.tanh(y + b_ref[...])


def fused_matmul_bn_relu(x, w, p, pt, gamma, beta):
    M, K = x.shape
    GC = w.shape[1]
    C = gamma.shape[0]
    return pl.pallas_call(
        _matmul_bn_relu_kernel,
        out_shape=jax.ShapeDtypeStruct((M, GC), jnp.float32),
        grid=(1,),
        in_specs=[pl.BlockSpec((M, K), lambda i: (0, 0)),
                  pl.BlockSpec((K, GC), lambda i: (0, 0)),
                  pl.BlockSpec((GC, C), lambda i: (0, 0)),
                  pl.BlockSpec((C, GC), lambda i: (0, 0)),
                  pl.BlockSpec((1, C), lambda i: (0, 0)),
                  pl.BlockSpec((1, C), lambda i: (0, 0))],
        out_specs=pl.BlockSpec((M, GC), lambda i: (0, 0)),
    )(x, w, p, pt, gamma.reshape(1, C), beta.reshape(1, C))


def fused_matmul_bias_tanh(x, w, bias_gc):
    M, K = x.shape
    GC = w.shape[1]
    return pl.pallas_call(
        _matmul_bias_tanh_kernel,
        out_shape=jax.ShapeDtypeStruct((M, GC), jnp.float32),
        grid=(1,),
        in_specs=[pl.BlockSpec((M, K), lambda i: (0, 0)),
                  pl.BlockSpec((K, GC), lambda i: (0, 0)),
                  pl.BlockSpec((1, GC), lambda i: (0, 0))],
        out_specs=pl.BlockSpec((M, GC), lambda i: (0, 0)),
    )(x, w, bias_gc)


# ----------------------------- sub-pixel deconv glue -------------------------

def _im2col_3x3(x_nhwc):
    """3x3 'valid' patches of the 1-pixel zero-padded NHWC tensor, flattened to
    (N*H*W, 9*Cin) with tap-major / channel-minor column order."""
    N, H, W, Cin = x_nhwc.shape
    xp = jnp.pad(x_nhwc, ((0, 0), (1, 1), (1, 1), (0, 0)))
    taps = [xp[:, rh:rh + H, rw:rw + W, :] for rh in range(3) for rw in range(3)]
    return jnp.concatenate(taps, axis=-1).reshape(N * H * W, 9 * Cin)


def _pixel_shuffle(cols, N, H, W, cout):
    """(N*H*W, 4*cout) phase-major columns -> (N, 2H, 2W, cout)."""
    x = cols.reshape(N, H, W, 2, 2, cout)
    x = jnp.transpose(x, (0, 1, 3, 2, 4, 5))
    return x.reshape(N, 2 * H, 2 * W, cout)


def _subpixel_weight(w):
    """ConvTranspose2d(k=4, s=2, p=1) weight (Cin, Cout, 4, 4) -> im2col weight
    (9*Cin, 4*Cout) for the sub-pixel decomposition: output pixel (2m+ph, 2n+pw)
    = sum_{dh,dw} xpad[m+ph+dh, n+pw+dw] * W[3-ph-2dh, 3-pw-2dw]."""
    Cin, Cout = w.shape[0], w.shape[1]
    wb = jnp.zeros((9, Cin, 4, Cout), jnp.float32)
    for ph in range(2):
        for pw in range(2):
            g = ph * 2 + pw
            for dh in range(2):
                for dw in range(2):
                    t = (ph + dh) * 3 + (pw + dw)
                    kh, kw = 3 - ph - 2 * dh, 3 - pw - 2 * dw
                    wb = wb.at[t, :, g, :].set(w[:, :, kh, kw])
    return wb.reshape(9 * Cin, 4 * Cout)


# ---------------------------------- model ------------------------------------

class BigDecoderPallas:
    def __init__(self, latent_dim=16, conv_dim=8, image_size=16,
                 dist='deterministic', g_std=1, key=jax.random.PRNGKey(42)):
        assert dist == 'deterministic'
        # TODO(synk): gaussian (chunk + reparameterize) / implicit (add_noise) heads
        #             and the Generator's spectral_norm / self-attention are not wired
        #             (Generator source not included in the reference snippet).
        # TODO(synk): BatchNorm uses training-mode batch statistics; eval-mode
        #             running statistics are not implemented.
        self.latent_dim = latent_dim
        self.image_size = image_size
        self.out_channels = 3
        repeat_num = int(math.log2(image_size)) - 3
        mult = 2 ** repeat_num
        c = conv_dim * mult
        self.c0 = c
        keys = iter(jax.random.split(key, 2 * (repeat_num + 2)))

        def winit(k, shape):
            return 0.05 * jax.random.normal(k, shape, jnp.float32)

        p = {}
        # layer1: ConvTranspose2d(latent_dim, c, 4) (1x1 -> 4x4). Its bias (and the
        # biases of all BN-followed deconvs) is cancelled by the mean subtraction of
        # training-mode BatchNorm, so those parameters are dropped (mathematical no-op).
        p['w0'] = winit(next(keys), (latent_dim, c, 4, 4)).reshape(latent_dim, c * 16)
        p['g0'] = jnp.ones((c,), jnp.float32)
        p['beta0'] = jnp.zeros((c,), jnp.float32)
        # layer1 matmul columns are (cout, kh, kw): group of 16 contiguous cols/channel.
        p['p0'] = jnp.repeat(jnp.eye(c, dtype=jnp.float32), 16, axis=0)     # (16c, c)
        p['pt0'] = p['p0'].T

        self.up = []
        cin = c
        for l in range(repeat_num):
            cout = cin // 2
            w = winit(next(keys), (cin, cout, 4, 4))
            p[f'w{l + 1}'] = _subpixel_weight(w)                            # (9cin, 4cout)
            p[f'g{l + 1}'] = jnp.ones((cout,), jnp.float32)
            p[f'beta{l + 1}'] = jnp.zeros((cout,), jnp.float32)
            # up-block matmul columns are (phase, cout): 4 phase groups per channel.
            p[f'p{l + 1}'] = jnp.tile(jnp.eye(cout, dtype=jnp.float32), (4, 1))
            p[f'pt{l + 1}'] = p[f'p{l + 1}'].T
            self.up.append((cin, cout))
            cin = cout

        w_last = winit(next(keys), (cin, self.out_channels, 4, 4))
        p['w_last'] = _subpixel_weight(w_last)                              # (9cin, 12)
        b_last = winit(next(keys), (self.out_channels,))
        p['b_last4'] = jnp.tile(b_last, 4).reshape(1, 4 * self.out_channels)
        self.params = p

    def __call__(self, z, mean=False, stats=False):
        p = self.params
        N = z.shape[0]
        c0 = self.c0
        # layer1: z -> 4x4 seed feature map, fused matmul + BN + ReLU (one kernel).
        h = fused_matmul_bn_relu(z, p['w0'], p['p0'], p['pt0'],
                                 p['g0'], p['beta0'])                       # (N, 16*c0)
        h = jnp.transpose(h.reshape(N, c0, 4, 4), (0, 2, 3, 1))             # NHWC

        # upsampling deconv blocks: im2col -> fused matmul+BN+ReLU -> pixel shuffle.
        for l, (cin, cout) in enumerate(self.up):
            Nh, Hh, Wh, _ = h.shape
            cols = _im2col_3x3(h)                                           # (NHW, 9cin)
            out = fused_matmul_bn_relu(cols, p[f'w{l + 1}'], p[f'p{l + 1}'],
                                       p[f'pt{l + 1}'], p[f'g{l + 1}'],
                                       p[f'beta{l + 1}'])                   # (NHW, 4cout)
            h = _pixel_shuffle(out, Nh, Hh, Wh, cout)                       # (N,2H,2W,cout)

        # last deconv + bias + tanh (one fused kernel; tanh commutes with the shuffle).
        Nh, Hh, Wh, _ = h.shape
        cols = _im2col_3x3(h)
        out = fused_matmul_bias_tanh(cols, p['w_last'], p['b_last4'])       # (NHW, 12)
        h = _pixel_shuffle(out, Nh, Hh, Wh, self.out_channels)              # (N,2H,2W,3)
        return jnp.transpose(h, (0, 3, 1, 2))                               # NCHW


if __name__ == "__main__":
    batch, latent_dim, conv_dim, image_size = 2, 16, 8, 16
    z = jax.random.normal(jax.random.PRNGKey(0), (batch, latent_dim), jnp.float32)
    model = BigDecoderPallas(latent_dim=latent_dim, conv_dim=conv_dim,
                             image_size=image_size, dist='deterministic',
                             key=jax.random.PRNGKey(1))
    fwd = jax.jit(lambda zz: model(zz))   # fuse the small JAX glue between kernels
    out = jax.block_until_ready(fwd(z))
    assert out.shape == (batch, 3, image_size, image_size), out.shape
    assert out.dtype == jnp.float32
    assert bool(jnp.all(jnp.isfinite(out)))
    print("KERNEL_OK")
</pallas_src>

<mosaic_0001>
module attributes {stable_mosaic.version = 11 : i64} {
  func.func @_matmul_bn_relu_kernel(%arg0: i32, %arg1: memref<2x16xf32, #tpu.memory_space<vmem>>, %arg2: memref<16x256xf32, #tpu.memory_space<vmem>>, %arg3: memref<256x16xf32, #tpu.memory_space<vmem>>, %arg4: memref<16x256xf32, #tpu.memory_space<vmem>>, %arg5: memref<1x16xf32, #tpu.memory_space<vmem>>, %arg6: memref<1x16xf32, #tpu.memory_space<vmem>>, %arg7: memref<2x256xf32, #tpu.memory_space<vmem>>) attributes {dimension_semantics = [#tpu.dimension_semantics<arbitrary>], iteration_bounds = array<i64: 1>, scalar_prefetch = 0 : i64, scratch_operands = 0 : i64, tpu.core_type = #tpu.core_type<tc>, window_params = [{pipeline_mode = #tpu.pipeline_mode<synchronous>, transform_indices = @transform_0, window_bounds = array<i64: 2, 16>}, {pipeline_mode = #tpu.pipeline_mode<synchronous>, transform_indices = @transform_1, window_bounds = array<i64: 16, 256>}, {pipeline_mode = #tpu.pipeline_mode<synchronous>, transform_indices = @transform_2, window_bounds = array<i64: 256, 16>}, {pipeline_mode = #tpu.pipeline_mode<synchronous>, transform_indices = @transform_3, window_bounds = array<i64: 16, 256>}, {pipeline_mode = #tpu.pipeline_mode<synchronous>, transform_indices = @transform_4, window_bounds = array<i64: 1, 16>}, {pipeline_mode = #tpu.pipeline_mode<synchronous>, transform_indices = @transform_5, window_bounds = array<i64: 1, 16>}, {pipeline_mode = #tpu.pipeline_mode<synchronous>, transform_indices = @transform_6, window_bounds = array<i64: 2, 256>}]} {
    %c0 = arith.constant 0 : index
    %c0_0 = arith.constant 0 : index
    %0 = vector.load %arg1[%c0, %c0_0] : memref<2x16xf32, #tpu.memory_space<vmem>>, vector<2x16xf32>
    %1 = arith.truncf %0 : vector<2x16xf32> to vector<2x16xbf16>
    %c0_1 = arith.constant 0 : index
    %c0_2 = arith.constant 0 : index
    %2 = vector.load %arg2[%c0_1, %c0_2] : memref<16x256xf32, #tpu.memory_space<vmem>>, vector<16x256xf32>
    %3 = arith.truncf %2 : vector<16x256xf32> to vector<16x256xbf16>
    %cst = arith.constant dense<0.000000e+00> : vector<2x256xf32>
    %4 = tpu.matmul %1, %3, %cst {dimension_numbers = #tpu.dot_dimension_numbers<[1], [0], [0], [1], [0, 0, 1, 1], [], []>} : vector<2x16xbf16>, vector<16x256xbf16>, vector<2x256xf32> -> vector<2x256xf32>
    %cst_3 = arith.constant dense<0.000000e+00> : vector<256xf32>
    %5 = vector.multi_reduction <add>, %4, %cst_3 [0] : vector<2x256xf32> to vector<256xf32>
    %6 = vector.shape_cast %5 : vector<256xf32> to vector<1x256xf32>
    %7 = arith.mulf %4, %4 : vector<2x256xf32>
    %cst_4 = arith.constant dense<0.000000e+00> : vector<256xf32>
    %8 = vector.multi_reduction <add>, %7, %cst_4 [0] : vector<2x256xf32> to vector<256xf32>
    %9 = vector.shape_cast %8 : vector<256xf32> to vector<1x256xf32>
    %c0_5 = arith.constant 0 : index
    %c0_6 = arith.constant 0 : index
    %10 = vector.load %arg3[%c0_5, %c0_6] : memref<256x16xf32, #tpu.memory_space<vmem>>, vector<256x16xf32>
    %cst_7 = arith.constant dense<0.000000e+00> : vector<1x16xf32>
    %11 = tpu.matmul %6, %10, %cst_7 {dimension_numbers = #tpu.dot_dimension_numbers<[1], [0], [0], [1], [0, 0, 1, 1], [], []>} : vector<1x256xf32>, vector<256x16xf32>, vector<1x16xf32> -> vector<1x16xf32>
    %cst_8 = arith.constant 3.200000e+01 : f32
    %12 = vector.broadcast %cst_8 : f32 to vector<1x16xf32>
    %13 = arith.divf %11, %12 : vector<1x16xf32>
    %c0_9 = arith.constant 0 : index
    %c0_10 = arith.constant 0 : index
    %14 = vector.load %arg3[%c0_9, %c0_10] : memref<256x16xf32, #tpu.memory_space<vmem>>, vector<256x16xf32>
    %cst_11 = arith.constant dense<0.000000e+00> : vector<1x16xf32>
    %15 = tpu.matmul %9, %14, %cst_11 {dimension_numbers = #tpu.dot_dimension_numbers<[1], [0], [0], [1], [0, 0, 1, 1], [], []>} : vector<1x256xf32>, vector<256x16xf32>, vector<1x16xf32> -> vector<1x16xf32>
    %cst_12 = arith.constant 3.200000e+01 : f32
    %16 = vector.broadcast %cst_12 : f32 to vector<1x16xf32>
    %17 = arith.divf %15, %16 : vector<1x16xf32>
    %18 = arith.mulf %13, %13 : vector<1x16xf32>
    %19 = arith.subf %17, %18 : vector<1x16xf32>
    %c0_13 = arith.constant 0 : index
    %c0_14 = arith.constant 0 : index
    %20 = vector.load %arg5[%c0_13, %c0_14] : memref<1x16xf32, #tpu.memory_space<vmem>>, vector<1x16xf32>
    %cst_15 = arith.constant 9.99999974E-6 : f32
    %21 = vector.broadcast %cst_15 : f32 to vector<1x16xf32>
    %22 = arith.addf %19, %21 : vector<1x16xf32>
    %23 = math.rsqrt %22 : vector<1x16xf32>
    %24 = arith.mulf %20, %23 : vector<1x16xf32>
    %c0_16 = arith.constant 0 : index
    %c0_17 = arith.constant 0 : index
    %25 = vector.load %arg6[%c0_16, %c0_17] : memref<1x16xf32, #tpu.memory_space<vmem>>, vector<1x16xf32>
    %26 = arith.mulf %13, %24 : vector<1x16xf32>
    %27 = arith.subf %25, %26 : vector<1x16xf32>
    %c0_18 = arith.constant 0 : index
    %c0_19 = arith.constant 0 : index
    %28 = vector.load %arg4[%c0_18, %c0_19] : memref<16x256xf32, #tpu.memory_space<vmem>>, vector<16x256xf32>
    %cst_20 = arith.constant dense<0.000000e+00> : vector<1x256xf32>
    %29 = tpu.matmul %24, %28, %cst_20 {dimension_numbers = #tpu.dot_dimension_numbers<[1], [0], [0], [1], [0, 0, 1, 1], [], []>} : vector<1x16xf32>, vector<16x256xf32>, vector<1x256xf32> -> vector<1x256xf32>
    %c0_21 = arith.constant 0 : index
    %c0_22 = arith.constant 0 : index
    %30 = vector.load %arg4[%c0_21, %c0_22] : memref<16x256xf32, #tpu.memory_space<vmem>>, vector<16x256xf32>
    %cst_23 = arith.constant dense<0.000000e+00> : vector<1x256xf32>
    %31 = tpu.matmul %27, %30, %cst_23 {dimension_numbers = #tpu.dot_dimension_numbers<[1], [0], [0], [1], [0, 0, 1, 1], [], []>} : vector<1x16xf32>, vector<16x256xf32>, vector<1x256xf32> -> vector<1x256xf32>
    %32 = vector.broadcast %29 : vector<1x256xf32> to vector<2x256xf32>
    %33 = arith.mulf %4, %32 : vector<2x256xf32>
    %34 = vector.broadcast %31 : vector<1x256xf32> to vector<2x256xf32>
    %35 = arith.addf %33, %34 : vector<2x256xf32>
    %cst_24 = arith.constant 0.000000e+00 : f32
    %36 = vector.broadcast %cst_24 : f32 to vector<2x256xf32>
    %37 = arith.maximumf %35, %36 : vector<2x256xf32>
    %c0_25 = arith.constant 0 : index
    %c0_26 = arith.constant 0 : index
    %38 = vector.load %arg7[%c0_25, %c0_26] : memref<2x256xf32, #tpu.memory_space<vmem>>, vector<2x256xf32>
    tpu.vector_store %arg7[%c0_25, %c0_26], %37 {strides = array<i32>} : memref<2x256xf32, #tpu.memory_space<vmem>>, vector<2x256xf32>,
    return
  }
  func.func @transform_0(%arg0: i32) -> (i32, i32) {
    %c0_i32 = arith.constant 0 : i32
    %c0_i32_0 = arith.constant 0 : i32
    %c0_i32_1 = arith.constant 0 : i32
    return %c0_i32, %c0_i32_0 : i32, i32
  }
  func.func @transform_1(%arg0: i32) -> (i32, i32) {
    %c0_i32 = arith.constant 0 : i32
    %c0_i32_0 = arith.constant 0 : i32
    %c0_i32_1 = arith.constant 0 : i32
    return %c0_i32, %c0_i32_0 : i32, i32
  }
  func.func @transform_2(%arg0: i32) -> (i32, i32) {
    %c0_i32 = arith.constant 0 : i32
    %c0_i32_0 = arith.constant 0 : i32
    %c0_i32_1 = arith.constant 0 : i32
    return %c0_i32, %c0_i32_0 : i32, i32
  }
  func.func @transform_3(%arg0: i32) -> (i32, i32) {
    %c0_i32 = arith.constant 0 : i32
    %c0_i32_0 = arith.constant 0 : i32
    %c0_i32_1 = arith.constant 0 : i32
    return %c0_i32, %c0_i32_0 : i32, i32
  }
  func.func @transform_4(%arg0: i32) -> (i32, i32) {
    %c0_i32 = arith.constant 0 : i32
    %c0_i32_0 = arith.constant 0 : i32
    %c0_i32_1 = arith.constant 0 : i32
    return %c0_i32, %c0_i32_0 : i32, i32
  }
  func.func @transform_5(%arg0: i32) -> (i32, i32) {
    %c0_i32 = arith.constant 0 : i32
    %c0_i32_0 = arith.constant 0 : i32
    %c0_i32_1 = arith.constant 0 : i32
    return %c0_i32, %c0_i32_0 : i32, i32
  }
  func.func @transform_6(%arg0: i32) -> (i32, i32) {
    %c0_i32 = arith.constant 0 : i32
    %c0_i32_0 = arith.constant 0 : i32
    %c0_i32_1 = arith.constant 0 : i32
    return %c0_i32, %c0_i32_0 : i32, i32
  }
}

module attributes {stable_mosaic.version = 11 : i64} {
  func.func @_matmul_bn_relu_kernel(%arg0: i32, %arg1: memref<32x144xf32, #tpu.memory_space<vmem>>, %arg2: memref<144x32xf32, #tpu.memory_space<vmem>>, %arg3: memref<32x8xf32, #tpu.memory_space<vmem>>, %arg4: memref<8x32xf32, #tpu.memory_space<vmem>>, %arg5: memref<1x8xf32, #tpu.memory_space<vmem>>, %arg6: memref<1x8xf32, #tpu.memory_space<vmem>>, %arg7: memref<32x32xf32, #tpu.memory_space<vmem>>) attributes {dimension_semantics = [#tpu.dimension_semantics<arbitrary>], iteration_bounds = array<i64: 1>, scalar_prefetch = 0 : i64, scratch_operands = 0 : i64, tpu.core_type = #tpu.core_type<tc>, window_params = [{pipeline_mode = #tpu.pipeline_mode<synchronous>, transform_indices = @transform_0, window_bounds = array<i64: 32, 144>}, {pipeline_mode = #tpu.pipeline_mode<synchronous>, transform_indices = @transform_1, window_bounds = array<i64: 144, 32>}, {pipeline_mode = #tpu.pipeline_mode<synchronous>, transform_indices = @transform_2, window_bounds = array<i64: 32, 8>}, {pipeline_mode = #tpu.pipeline_mode<synchronous>, transform_indices = @transform_3, window_bounds = array<i64: 8, 32>}, {pipeline_mode = #tpu.pipeline_mode<synchronous>, transform_indices = @transform_4, window_bounds = array<i64: 1, 8>}, {pipeline_mode = #tpu.pipeline_mode<synchronous>, transform_indices = @transform_5, window_bounds = array<i64: 1, 8>}, {pipeline_mode = #tpu.pipeline_mode<synchronous>, transform_indices = @transform_6, window_bounds = array<i64: 32, 32>}]} {
    %c0 = arith.constant 0 : index
    %c0_0 = arith.constant 0 : index
    %0 = vector.load %arg1[%c0, %c0_0] : memref<32x144xf32, #tpu.memory_space<vmem>>, vector<32x144xf32>
    %1 = arith.truncf %0 : vector<32x144xf32> to vector<32x144xbf16>
    %c0_1 = arith.constant 0 : index
    %c0_2 = arith.constant 0 : index
    %2 = vector.load %arg2[%c0_1, %c0_2] : memref<144x32xf32, #tpu.memory_space<vmem>>, vector<144x32xf32>
    %3 = arith.truncf %2 : vector<144x32xf32> to vector<144x32xbf16>
    %cst = arith.constant dense<0.000000e+00> : vector<32x32xf32>
    %4 = tpu.matmul %1, %3, %cst {dimension_numbers = #tpu.dot_dimension_numbers<[1], [0], [0], [1], [0, 0, 1, 1], [], []>} : vector<32x144xbf16>, vector<144x32xbf16>, vector<32x32xf32> -> vector<32x32xf32>
    %cst_3 = arith.constant dense<0.000000e+00> : vector<32xf32>
    %5 = vector.multi_reduction <add>, %4, %cst_3 [0] : vector<32x32xf32> to vector<32xf32>
    %6 = vector.shape_cast %5 : vector<32xf32> to vector<1x32xf32>
    %7 = arith.mulf %4, %4 : vector<32x32xf32>
    %cst_4 = arith.constant dense<0.000000e+00> : vector<32xf32>
    %8 = vector.multi_reduction <add>, %7, %cst_4 [0] : vector<32x32xf32> to vector<32xf32>
    %9 = vector.shape_cast %8 : vector<32xf32> to vector<1x32xf32>
    %c0_5 = arith.constant 0 : index
    %c0_6 = arith.constant 0 : index
    %10 = vector.load %arg3[%c0_5, %c0_6] : memref<32x8xf32, #tpu.memory_space<vmem>>, vector<32x8xf32>
    %cst_7 = arith.constant dense<0.000000e+00> : vector<1x8xf32>
    %11 = tpu.matmul %6, %10, %cst_7 {dimension_numbers = #tpu.dot_dimension_numbers<[1], [0], [0], [1], [0, 0, 1, 1], [], []>} : vector<1x32xf32>, vector<32x8xf32>, vector<1x8xf32> -> vector<1x8xf32>
    %cst_8 = arith.constant 1.280000e+02 : f32
    %12 = vector.broadcast %cst_8 : f32 to vector<1x8xf32>
    %13 = arith.divf %11, %12 : vector<1x8xf32>
    %c0_9 = arith.constant 0 : index
    %c0_10 = arith.constant 0 : index
    %14 = vector.load %arg3[%c0_9, %c0_10] : memref<32x8xf32, #tpu.memory_space<vmem>>, vector<32x8xf32>
    %cst_11 = arith.constant dense<0.000000e+00> : vector<1x8xf32>
    %15 = tpu.matmul %9, %14, %cst_11 {dimension_numbers = #tpu.dot_dimension_numbers<[1], [0], [0], [1], [0, 0, 1, 1], [], []>} : vector<1x32xf32>, vector<32x8xf32>, vector<1x8xf32> -> vector<1x8xf32>
    %cst_12 = arith.constant 1.280000e+02 : f32
    %16 = vector.broadcast %cst_12 : f32 to vector<1x8xf32>
    %17 = arith.divf %15, %16 : vector<1x8xf32>
    %18 = arith.mulf %13, %13 : vector<1x8xf32>
    %19 = arith.subf %17, %18 : vector<1x8xf32>
    %c0_13 = arith.constant 0 : index
    %c0_14 = arith.constant 0 : index
    %20 = vector.load %arg5[%c0_13, %c0_14] : memref<1x8xf32, #tpu.memory_space<vmem>>, vector<1x8xf32>
    %cst_15 = arith.constant 9.99999974E-6 : f32
    %21 = vector.broadcast %cst_15 : f32 to vector<1x8xf32>
    %22 = arith.addf %19, %21 : vector<1x8xf32>
    %23 = math.rsqrt %22 : vector<1x8xf32>
    %24 = arith.mulf %20, %23 : vector<1x8xf32>
    %c0_16 = arith.constant 0 : index
    %c0_17 = arith.constant 0 : index
    %25 = vector.load %arg6[%c0_16, %c0_17] : memref<1x8xf32, #tpu.memory_space<vmem>>, vector<1x8xf32>
    %26 = arith.mulf %13, %24 : vector<1x8xf32>
    %27 = arith.subf %25, %26 : vector<1x8xf32>
    %c0_18 = arith.constant 0 : index
    %c0_19 = arith.constant 0 : index
    %28 = vector.load %arg4[%c0_18, %c0_19] : memref<8x32xf32, #tpu.memory_space<vmem>>, vector<8x32xf32>
    %cst_20 = arith.constant dense<0.000000e+00> : vector<1x32xf32>
    %29 = tpu.matmul %24, %28, %cst_20 {dimension_numbers = #tpu.dot_dimension_numbers<[1], [0], [0], [1], [0, 0, 1, 1], [], []>} : vector<1x8xf32>, vector<8x32xf32>, vector<1x32xf32> -> vector<1x32xf32>
    %c0_21 = arith.constant 0 : index
    %c0_22 = arith.constant 0 : index
    %30 = vector.load %arg4[%c0_21, %c0_22] : memref<8x32xf32, #tpu.memory_space<vmem>>, vector<8x32xf32>
    %cst_23 = arith.constant dense<0.000000e+00> : vector<1x32xf32>
    %31 = tpu.matmul %27, %30, %cst_23 {dimension_numbers = #tpu.dot_dimension_numbers<[1], [0], [0], [1], [0, 0, 1, 1], [], []>} : vector<1x8xf32>, vector<8x32xf32>, vector<1x32xf32> -> vector<1x32xf32>
    %32 = vector.broadcast %29 : vector<1x32xf32> to vector<32x32xf32>
    %33 = arith.mulf %4, %32 : vector<32x32xf32>
    %34 = vector.broadcast %31 : vector<1x32xf32> to vector<32x32xf32>
    %35 = arith.addf %33, %34 : vector<32x32xf32>
    %cst_24 = arith.constant 0.000000e+00 : f32
    %36 = vector.broadcast %cst_24 : f32 to vector<32x32xf32>
    %37 = arith.maximumf %35, %36 : vector<32x32xf32>
    %c0_25 = arith.constant 0 : index
    %c0_26 = arith.constant 0 : index
    %38 = vector.load %arg7[%c0_25, %c0_26] : memref<32x32xf32, #tpu.memory_space<vmem>>, vector<32x32xf32>
    tpu.vector_store %arg7[%c0_25, %c0_26], %37 {strides = array<i32>} : memref<32x32xf32, #tpu.memory_space<vmem>>, vector<32x32xf32>,
    return
  }
  func.func @transform_0(%arg0: i32) -> (i32, i32) {
    %c0_i32 = arith.constant 0 : i32
    %c0_i32_0 = arith.constant 0 : i32
    %c0_i32_1 = arith.constant 0 : i32
    return %c0_i32, %c0_i32_0 : i32, i32
  }
  func.func @transform_1(%arg0: i32) -> (i32, i32) {
    %c0_i32 = arith.constant 0 : i32
    %c0_i32_0 = arith.constant 0 : i32
    %c0_i32_1 = arith.constant 0 : i32
    return %c0_i32, %c0_i32_0 : i32, i32
  }
  func.func @transform_2(%arg0: i32) -> (i32, i32) {
    %c0_i32 = arith.constant 0 : i32
    %c0_i32_0 = arith.constant 0 : i32
    %c0_i32_1 = arith.constant 0 : i32
    return %c0_i32, %c0_i32_0 : i32, i32
  }
  func.func @transform_3(%arg0: i32) -> (i32, i32) {
    %c0_i32 = arith.constant 0 : i32
    %c0_i32_0 = arith.constant 0 : i32
    %c0_i32_1 = arith.constant 0 : i32
    return %c0_i32, %c0_i32_0 : i32, i32
  }
  func.func @transform_4(%arg0: i32) -> (i32, i32) {
    %c0_i32 = arith.constant 0 : i32
    %c0_i32_0 = arith.constant 0 : i32
    %c0_i32_1 = arith.constant 0 : i32
    return %c0_i32, %c0_i32_0 : i32, i32
  }
  func.func @transform_5(%arg0: i32) -> (i32, i32) {
    %c0_i32 = arith.constant 0 : i32
    %c0_i32_0 = arith.constant 0 : i32
    %c0_i32_1 = arith.constant 0 : i32
    return %c0_i32, %c0_i32_0 : i32, i32
  }
  func.func @transform_6(%arg0: i32) -> (i32, i32) {
    %c0_i32 = arith.constant 0 : i32
    %c0_i32_0 = arith.constant 0 : i32
    %c0_i32_1 = arith.constant 0 : i32
    return %c0_i32, %c0_i32_0 : i32, i32
  }
}

module attributes {stable_mosaic.version = 11 : i64} {
  func.func @_matmul_bias_tanh_kernel(%arg0: i32, %arg1: memref<128x72xf32, #tpu.memory_space<vmem>>, %arg2: memref<72x12xf32, #tpu.memory_space<vmem>>, %arg3: memref<1x12xf32, #tpu.memory_space<vmem>>, %arg4: memref<128x12xf32, #tpu.memory_space<vmem>>) attributes {dimension_semantics = [#tpu.dimension_semantics<arbitrary>], iteration_bounds = array<i64: 1>, scalar_prefetch = 0 : i64, scratch_operands = 0 : i64, tpu.core_type = #tpu.core_type<tc>, window_params = [{pipeline_mode = #tpu.pipeline_mode<synchronous>, transform_indices = @transform_0, window_bounds = array<i64: 128, 72>}, {pipeline_mode = #tpu.pipeline_mode<synchronous>, transform_indices = @transform_1, window_bounds = array<i64: 72, 12>}, {pipeline_mode = #tpu.pipeline_mode<synchronous>, transform_indices = @transform_2, window_bounds = array<i64: 1, 12>}, {pipeline_mode = #tpu.pipeline_mode<synchronous>, transform_indices = @transform_3, window_bounds = array<i64: 128, 12>}]} {
    %c0 = arith.constant 0 : index
    %c0_0 = arith.constant 0 : index
    %0 = vector.load %arg1[%c0, %c0_0] : memref<128x72xf32, #tpu.memory_space<vmem>>, vector<128x72xf32>
    %1 = arith.truncf %0 : vector<128x72xf32> to vector<128x72xbf16>
    %c0_1 = arith.constant 0 : index
    %c0_2 = arith.constant 0 : index
    %2 = vector.load %arg2[%c0_1, %c0_2] : memref<72x12xf32, #tpu.memory_space<vmem>>, vector<72x12xf32>
    %3 = arith.truncf %2 : vector<72x12xf32> to vector<72x12xbf16>
    %cst = arith.constant dense<0.000000e+00> : vector<128x12xf32>
    %4 = tpu.matmul %1, %3, %cst {dimension_numbers = #tpu.dot_dimension_numbers<[1], [0], [0], [1], [0, 0, 1, 1], [], []>} : vector<128x72xbf16>, vector<72x12xbf16>, vector<128x12xf32> -> vector<128x12xf32>
    %c0_3 = arith.constant 0 : index
    %c0_4 = arith.constant 0 : index
    %5 = vector.load %arg3[%c0_3, %c0_4] : memref<1x12xf32, #tpu.memory_space<vmem>>, vector<1x12xf32>
    %6 = vector.broadcast %5 : vector<1x12xf32> to vector<128x12xf32>
    %7 = arith.addf %4, %6 : vector<128x12xf32>
    %8 = math.tanh %7 : vector<128x12xf32>
    %c0_5 = arith.constant 0 : index
    %c0_6 = arith.constant 0 : index
    %9 = vector.load %arg4[%c0_5, %c0_6] : memref<128x12xf32, #tpu.memory_space<vmem>>, vector<128x12xf32>
    tpu.vector_store %arg4[%c0_5, %c0_6], %8 {strides = array<i32>} : memref<128x12xf32, #tpu.memory_space<vmem>>, vector<128x12xf32>,
    return
  }
  func.func @transform_0(%arg0: i32) -> (i32, i32) {
    %c0_i32 = arith.constant 0 : i32
    %c0_i32_0 = arith.constant 0 : i32
    %c0_i32_1 = arith.constant 0 : i32
    return %c0_i32, %c0_i32_0 : i32, i32
  }
  func.func @transform_1(%arg0: i32) -> (i32, i32) {
    %c0_i32 = arith.constant 0 : i32
    %c0_i32_0 = arith.constant 0 : i32
    %c0_i32_1 = arith.constant 0 : i32
    return %c0_i32, %c0_i32_0 : i32, i32
  }
  func.func @transform_2(%arg0: i32) -> (i32, i32) {
    %c0_i32 = arith.constant 0 : i32
    %c0_i32_0 = arith.constant 0 : i32
    %c0_i32_1 = arith.constant 0 : i32
    return %c0_i32, %c0_i32_0 : i32, i32
  }
  func.func @transform_3(%arg0: i32) -> (i32, i32) {
    %c0_i32 = arith.constant 0 : i32
    %c0_i32_0 = arith.constant 0 : i32
    %c0_i32_1 = arith.constant 0 : i32
    return %c0_i32, %c0_i32_0 : i32, i32
  }
}

</mosaic_0001>

<bundles_post_ra>
// kernel: _lambda_.3
= control target key start
LH: loop header
LB: loop body
LE: loop exit
PB: predicated region body
PF: predicated region fallthrough
CT: control target
= control target key end

     0   :  { %11 = vsyncpa [#allocation3], 0  ;;  %s822_s0 = inlined_call_operand.vmem [shape: f32[2,16], index: 0, kind: input, shape index: {}]   ;;  %s823_s1 = inlined_call_operand.hbm [shape: f32[16,256], index: 1, kind: input, shape index: {}]   ;;  %s824_s2 = inlined_call_operand.hbm [shape: f32[256,16], index: 2, kind: input, shape index: {}]   ;;  %s825_s3 = inlined_call_operand.vmem [shape: f32[16,256], index: 3, kind: input, shape index: {}]   ;;  %s826_s4 = inlined_call_operand.vmem [shape: f32[1,16], index: 4, kind: input, shape index: {}]   ;;  %s827_s5 = inlined_call_operand.vmem [shape: f32[1,16], index: 5, kind: input, shape index: {}]   ;;  %s828_s6 = inlined_call_operand.vmem [shape: f32[2,256], index: 6, kind: output, shape index: {}]  }
   0x1   :  { %12 = vsyncpa [#allocation5], 0  ;;  %s716_s21 = smov [#allocation2]   ;;  %s668_s25 = scalar_lea.hbm %s823_s1, 512 }
   0x2   :  { %s20_s22 = sshll.u32 %s716_s21, 4  ;;  %p669_p0 = scmp.ne.s32.totalorder %s823_s1, %s668_s25  ;;  %s21_s22 = int_to_ptr.vmem [resolvable:$true] %s20_s22 }
   0x3   :  { %p672_p1 = scmp.lt.u32.totalorder %s668_s25, %s823_s1 }
   0x5   :  { %p674_p2 = pnand %p672_p1, %p669_p0 }
   0x7   :  { %677 = shalt.err (!%p674_p2)
}
   0x8   :  { %s678_s30 = scalar_lea.vmem %s21_s22, 512  ;;  %p683_p4 = scmp.lt.s32.totalorder %s21_s22, %s21_s22 }
   0x9   :  { %p679_p3 = scmp.ne.s32.totalorder %s21_s22, %s678_s30  ;;  %p684_p5 = scmp.lt.s32.totalorder %s678_s30, %s678_s30 }
   0xb   :  { %p685_p6 = por %p684_p5, %p683_p4 }
   0xd   :  { %p686_p7 = pnand %p685_p6, %p679_p3 }
   0xf   :  { %689 = shalt.err (!%p686_p7)
}
  0x10   :  { %s717_s7 = smov 256   ;;  %s718_s8 = smov 16  }
  0x11   :  { %26 = dma.hbm_to_vmem [thread:$0]  %s823_s1, 512, %s21_s22, [#allocation3], %s717_s7, %s717_s7, %s718_s8  }
  0x12   :  { %s719_s11 = smov [#allocation4]   ;;  %s690_s15 = scalar_lea.hbm %s824_s2, 4096 }
  0x13   :  { %s32_s12 = sshll.u32 %s719_s11, 4  ;;  %p691_p8 = scmp.ne.s32.totalorder %s824_s2, %s690_s15  ;;  %s33_s12 = int_to_ptr.vmem [resolvable:$true] %s32_s12 }
  0x14   :  { %p694_p9 = scmp.lt.u32.totalorder %s690_s15, %s824_s2 }
  0x16   :  { %p696_p10 = pnand %p694_p9, %p691_p8 }
  0x18   :  { %699 = shalt.err (!%p696_p10)
}
  0x19   :  { %s700_s20 = scalar_lea.vmem %s33_s12, 4096  ;;  %p705_p12 = scmp.lt.s32.totalorder %s33_s12, %s33_s12 }
  0x1a   :  { %p701_p11 = scmp.ne.s32.totalorder %s33_s12, %s700_s20  ;;  %p706_p13 = scmp.lt.s32.totalorder %s700_s20, %s700_s20 }
  0x1c   :  { %p707_p0 = por %p706_p13, %p705_p12 }
  0x1e   :  { %p708_p1 = pnand %p707_p0, %p701_p11 }
  0x20   :  { %711 = shalt.err (!%p708_p1)
}
  0x21   :  { %s720_s1 = smov 128   ;;  %s721_s21 = smov 8  }
  0x22   :  { %38 = dma.hbm_to_vmem [thread:$0]  %s824_s2, 4096, %s33_s12, [#allocation5], %s720_s1, %s720_s1, %s721_s21  }
  0x23   :  { %712 = dma.done.wait [#allocation3], 512  }
  0x24   :  { %713 = vsyncadd [#allocation3], 4294966784 }
  0x25   :  { %714 = dma.done.wait [#allocation5], 4096  }
  0x26   :  { %715 = vsyncadd [#allocation5], 4294963200  ;;  %v722_v0 = vmov 0   ;;  %v55_v1 = vld [vmem:[#allocation2 + $0x8] sm:$0xff]  ;;  %v57_v2 = vld [vmem:[#allocation2 + $0x18] sm:$0xff]  ;;  %vm60_vm0 = vcmask 130048  }
  0x27   :  { %96 = vmatprep.mubr.bf16.mxu0 %v722_v0  ;;  %v54_v3 = vld [vmem:[#allocation2] sm:$0xff]  ;;  %v59_v4 = vpack.c.bf16 %v57_v2, %v55_v1  ;;  %v56_v5 = vld [vmem:[#allocation2 + $0x10] sm:$0xff]  ;;  %v153_v9 = vld [vmem:[#allocation4 + $0x88] sm:$0xff]  ;;  %vm105_vm1 = vcmask 1041408  }
  0x28   :  { %v52_v6 = vld [vmem:[%s822_s0] sm:$0x3]  ;;  %v58_v8 = vpack.c.bf16 %v56_v5, %v54_v3  ;;  %v137_v11 = vld [vmem:[#allocation4 + $0x8] sm:$0xff]  ;;  %v154_v15 = vld [vmem:[#allocation4 + $0x90] sm:$0xff] }
  0x29   :  { %v152_v7 = vld [vmem:[#allocation4 + $0x80] sm:$0xff]  ;;  %64 = vmatprep.subr.bf16.mxu0 %v59_v4  ;;  %v53_v12 = vpack.c.bf16 %v52_v6, %v52_v6  ;;  %v155_v16 = vld [vmem:[#allocation4 + $0x98] sm:$0xff]  ;;  %v138_v17 = vld [vmem:[#allocation4 + $0x10] sm:$0xff] }
  0x2a   :  { %v136_v10 = vld [vmem:[#allocation4] sm:$0xff]  ;;  %v586_v13 = vpack.c.bf16 %v153_v9, %v152_v7  ;;  %65 = vmatpush1.bf16.msra.mxu0 %v58_v8  ;;  %v590_v18 = vpack.c.bf16 %v155_v16, %v154_v15  ;;  %v139_v19 = vld [vmem:[#allocation4 + $0x18] sm:$0xff]  ;;  %v157_v21 = vld [vmem:[#allocation4 + $0xa8] sm:$0xff] }
  0x2b   :  { %v588_v14 = vpack.c.bf16 %v137_v11, %v136_v10  ;;  %v156_v20 = vld [vmem:[#allocation4 + $0xa0] sm:$0xff]  ;;  %v592_v22 = vpack.c.bf16 %v139_v19, %v138_v17  ;;  %v141_v25 = vld [vmem:[#allocation4 + $0x28] sm:$0xff]  ;;  %v158_v26 = vld [vmem:[#allocation4 + $0xb0] sm:$0xff] }
  0x2c   :  { %587 = vmatprep.subr.bf16.mxu1 %v586_v13  ;;  %619 = vmatprep.subr.bf16.mxu0 %v586_v13  ;;  %v594_v23 = vpack.c.bf16 %v157_v21, %v156_v20  ;;  %v140_v24 = vld [vmem:[#allocation4 + $0x20] sm:$0xff]  ;;  %v159_v27 = vld [vmem:[#allocation4 + $0xb8] sm:$0xff]  ;;  %v142_v30 = vld [vmem:[#allocation4 + $0x30] sm:$0xff] }
  0x2d   :  { %589 = vmatpush3.bf16.msra.mxu1 %v588_v14  ;;  %512 = vmatmul.mubr.msk.bf16.vlgmr.msra.gmra.mrb[0].mxu0 %vm60_vm0, %v53_v12  ;;  %v596_v28 = vpack.c.bf16 %v141_v25, %v140_v24  ;;  %v598_v29 = vpack.c.bf16 %v159_v27, %v158_v26  ;;  %v143_v31 = vld [vmem:[#allocation4 + $0x38] sm:$0xff]  ;;  %v160_v33 = vld [vmem:[#allocation4 + $0xc0] sm:$0xff]  ;;  %v161_v34 = vld [vmem:[#allocation4 + $0xc8] sm:$0xff] }
  0x2e   :  { %591 = vmatprep.subr.bf16.mxu1 %v590_v18  ;;  %621 = vmatpush3.bf16.msra.mxu0 %v588_v14  ;;  %v600_v32 = vpack.c.bf16 %v143_v31, %v142_v30  ;;  %v602_v35 = vpack.c.bf16 %v161_v34, %v160_v33  ;;  %v144_v36 = vld [vmem:[#allocation4 + $0x40] sm:$0xff]  ;;  %v145_v37 = vld [vmem:[#allocation4 + $0x48] sm:$0xff]  ;;  %v162_v39 = vld [vmem:[#allocation4 + $0xd0] sm:$0xff] }
  0x2f   :  { %623 = vmatprep.subr.bf16.mxu0 %v590_v18  ;;  %v604_v38 = vpack.c.bf16 %v145_v37, %v144_v36  ;;  %v163_v40 = vld [vmem:[#allocation4 + $0xd8] sm:$0xff]  ;;  %v146_v42 = vld [vmem:[#allocation4 + $0x50] sm:$0xff]  ;;  %v164_v45 = vld [vmem:[#allocation4 + $0xe0] sm:$0xff] }
  0x30   :  { %v606_v41 = vpack.c.bf16 %v163_v40, %v162_v39  ;;  %v147_v43 = vld [vmem:[#allocation4 + $0x58] sm:$0xff]  ;;  %v165_v46 = vld [vmem:[#allocation4 + $0xe8] sm:$0xff]  ;;  %v148_v48 = vld [vmem:[#allocation4 + $0x60] sm:$0xff] }
  0x31   :  { %593 = vmatpush3.bf16.msra.mxu1 %v592_v22  ;;  %v608_v44 = vpack.c.bf16 %v147_v43, %v146_v42  ;;  %v610_v47 = vpack.c.bf16 %v165_v46, %v164_v45  ;;  %v149_v49 = vld [vmem:[#allocation4 + $0x68] sm:$0xff]  ;;  %v166_v51 = vld [vmem:[#allocation4 + $0xf0] sm:$0xff]  ;;  %v167_v52 = vld [vmem:[#allocation4 + $0xf8] sm:$0xff] }
  0x32   :  { %595 = vmatprep.subr.bf16.mxu1 %v594_v23  ;;  %625 = vmatpush3.bf16.msra.mxu0 %v592_v22  ;;  %v612_v50 = vpack.c.bf16 %v149_v49, %v148_v48  ;;  %v614_v53 = vpack.c.bf16 %v167_v52, %v166_v51  ;;  %v150_v54 = vld [vmem:[#allocation4 + $0x70] sm:$0xff]  ;;  %v151_v55 = vld [vmem:[#allocation4 + $0x78] sm:$0xff]  ;;  %v321_v27 = vld [vmem:[%s825_s3 + $0x8] sm:$0xff]  ;;  %v472_v51 = vlaneseq }
  0x33   :  { %627 = vmatprep.subr.bf16.mxu0 %v594_v23  ;;  %v616_v56 = vpack.c.bf16 %v151_v55, %v150_v54  ;;  %v322_v31 = vld [vmem:[%s825_s3 + $0x10] sm:$0xff]  ;;  %v313_v45 = vld [vmem:[%s826_s4] sm:$0x1] }
  0x34   :  { %v317_v48 = vld [vmem:[%s827_s5] sm:$0x1]  ;;  %v473_v52 = vshrl.u32 %v472_v51, 7 }
  0x35   :  { %597 = vmatpush3.bf16.msra.mxu1 %v596_v28 }
  0x36   :  { %599 = vmatprep.subr.bf16.mxu1 %v598_v29  ;;  %629 = vmatpush3.bf16.msra.mxu0 %v596_v28  ;;  %v323_v28 = vld [vmem:[%s825_s3 + $0x18] sm:$0xff] }
  0x37   :  { %631 = vmatprep.subr.bf16.mxu0 %v598_v29  ;;  %v320_v29 = vld [vmem:[%s825_s3] sm:$0xff]  ;;  %v650_v30 = vpack.c.bf16 %v323_v28, %v321_v27 }
  0x38   :  { %v652_v33 = vpack.c.bf16 %v322_v31, %v320_v29 }
  0x39   :  { %601 = vmatpush3.bf16.msra.mxu1 %v600_v32 }
  0x3a   :  { %633 = vmatpush3.bf16.msra.mxu0 %v600_v32  ;;  %603 = vmatprep.subr.bf16.mxu1 %v602_v35  ;;  %v723_v32 = vmov 0.0  }
  0x3b   :  { %635 = vmatprep.subr.bf16.mxu0 %v602_v35 }
  0x3d   :  { %605 = vmatpush3.bf16.msra.mxu1 %v604_v38 }
  0x3e   :  { %637 = vmatpush3.bf16.msra.mxu0 %v604_v38  ;;  %607 = vmatprep.subr.bf16.mxu1 %v606_v41 }
  0x3f   :  { %639 = vmatprep.subr.bf16.mxu0 %v606_v41 }
  0x41   :  { %609 = vmatpush3.bf16.msra.mxu1 %v608_v44 }
  0x42   :  { %641 = vmatpush3.bf16.msra.mxu0 %v608_v44  ;;  %611 = vmatprep.subr.bf16.mxu1 %v610_v47 }
  0x43   :  { %643 = vmatprep.subr.bf16.mxu0 %v610_v47 }
  0x45   :  { %613 = vmatpush3.bf16.msra.mxu1 %v612_v50 }
  0x46   :  { %645 = vmatpush3.bf16.msra.mxu0 %v612_v50  ;;  %615 = vmatprep.subr.bf16.mxu1 %v614_v53 }
  0x47   :  { %647 = vmatprep.subr.bf16.mxu0 %v614_v53  ;;  %v474_v53 = vsub.s32 0, %v473_v52 }
  0x49   :  { %617 = vmatpush3.bf16.msra.mxu1 %v616_v56 }
  0x4a   :  { %649 = vmatpush3.bf16.msra.mxu0 %v616_v56  ;;  %651 = vmatprep.subr.bf16.mxu1 %v650_v30 }
  0x4b   :  { %655 = vmatprep.subr.bf16.mxu0 %v650_v30 }
 0x100   :  { %v787_v57 = vpop.f32.mrb[0].mxu0 }
 0x101   :  { %v106_v58 = vsel %vm105_vm1, %v787_v57, 0.0  ;;  %v120_v59 = vmul.f32 %v787_v57, %v787_v57  ;;  %v792_v60 = vpop.f32.mrb[1].mxu0 }
 0x102   :  { %v107_v61 = vrot.slane %v106_v58, 4  ;;  %v113_v62 = vsel %vm105_vm1, %v792_v60, 0.0  ;;  %v121_v63 = vmul.f32 %v792_v60, %v792_v60  ;;  %v102_v0 = vpop.f32.mrb[2].mxu0 }
 0x103   :  { %v122_v1 = vsel %vm105_vm1, %v120_v59, 0.0  ;;  %v114_v2 = vrot.slane %v113_v62, 4  ;;  %v103_v3 = vpop.f32.mrb[3].mxu0 }
 0x104   :  { %v108_v4 = vadd.f32 %v107_v61, %v106_v58  ;;  %v123_v5 = vrot.slane %v122_v1, 4  ;;  %v129_v6 = vsel %vm105_vm1, %v121_v63, 0.0 }
 0x105   :  { %v130_v7 = vrot.slane %v129_v6, 4  ;;  %v115_v8 = vadd.f32 %v114_v2, %v113_v62 }
 0x106   :  { %v109_v9 = vrot.slane %v108_v4, 2  ;;  %v124_v10 = vadd.f32 %v123_v5, %v122_v1 }
 0x107   :  { %v131_v11 = vadd.f32 %v130_v7, %v129_v6  ;;  %v116_v12 = vrot.slane %v115_v8, 2 }
 0x108   :  { %v125_v13 = vrot.slane %v124_v10, 2  ;;  %v110_v14 = vadd.f32 %v109_v9, %v108_v4 }
 0x109   :  { %v117_v15 = vadd.f32 %v116_v12, %v115_v8  ;;  %v132_v16 = vrot.slane %v131_v11, 2 }
 0x10a   :  { %v126_v17 = vadd.f32 %v125_v13, %v124_v10  ;;  %v111_v18 = vrot.slane %v110_v14, 1 }
 0x10b   :  { %v118_v19 = vrot.slane %v117_v15, 1  ;;  %v133_v20 = vadd.f32 %v132_v16, %v131_v11 }
 0x10c   :  { %v127_v21 = vrot.slane %v126_v17, 1  ;;  %v112_v24 = vadd.f32 %v111_v18, %v110_v14 }
 0x10d   :  { %v119_v22 = vadd.f32 %v118_v19, %v117_v15  ;;  %v134_v23 = vrot.slane %v133_v20, 1 }
 0x10e   :  { %v128_v26 = vadd.f32 %v127_v21, %v126_v17 }
 0x10f   :  { %232 = vmatprep.mubr.f32.mxu1 %v119_v22  ;;  %v135_v25 = vadd.f32 %v134_v23, %v133_v20 }
 0x110   :  { %233 = vmatmul.mubr.f32.vlgmr.msra.gmra.mrb[0].mxu1 %v112_v24 }
 0x111   :  { %304 = vmatprep.mubr.f32.mxu0 %v135_v25  ;;  %391 = vmatprep.mubr.f32.mxu1 %v723_v32 }
 0x112   :  { %305 = vmatmul.mubr.f32.vlgmr.msra.gmra.mrb[4].mxu0 %v128_v26  ;;  %653 = vmatpush1.bf16.msra.mxu1 %v652_v33 }
 0x113   :  { %465 = vmatprep.mubr.f32.mxu0 %v723_v32  ;;  %657 = vmatpush1.bf16.msra.mxu0 %v652_v33 }
 0x1e3   :  { %v548_v34 = vpop.f32.mrb[0].mxu1 }
 0x1e4   :  { %v549_v35 = vpop.f32.mrb[1].mxu1 }
 0x1e5   :  { %v550_v36 = vadd.f32 %v549_v35, %v548_v34  ;;  %v583_v37 = vpop.f32.mrb[4].mxu0 }
 0x1e6   :  { %v584_v38 = vpop.f32.mrb[5].mxu0 }
 0x1e7   :  { %v239_v39 = vmul.f32 0.03125, %v550_v36  ;;  %v585_v40 = vadd.f32 %v584_v38, %v583_v37 }
 0x1e9   :  { %v311_v41 = vmul.f32 %v239_v39, %v239_v39  ;;  %v310_v42 = vmul.f32 0.03125, %v585_v40 }
 0x1eb   :  { %v312_v43 = vsub.f32 %v310_v42, %v311_v41 }
 0x1ed   :  { %v314_v44 = vadd.f32 1e-05, %v312_v43 }
 0x1ef   :  { %666 = vrsqrt.f32 %v314_v44 }
 0x1f9   :  { %v667_v46 = vpop.eup %666 }
 0x1fa   :  { %v316_v47 = vmul.f32 %v667_v46, %v313_v45 }
 0x1fc   :  { %513 = vmatmul.mubr.msk.f32.vlgmr.msra.gmra.mrb[2].mxu1 %vm60_vm0, %v316_v47  ;;  %v318_v49 = vmul.f32 %v316_v47, %v239_v39 }
 0x1fe   :  { %v319_v50 = vsub.f32 %v317_v48, %v318_v49 }
 0x200   :  { %514 = vmatmul.mubr.msk.f32.vlgmr.msra.gmra.mrb[6].mxu0 %vm60_vm0, %v319_v50 }
 0x2cf   :  { %v393_v54 = vpop.f32.mrb[2].mxu1 }
 0x2d0   :  { %v475_v55 = vrot.slane %v393_v54, %v474_v53  ;;  %v395_v56 = vpop.f32.mrb[3].mxu1 }
 0x2d1   :  { %v479_v58 = vrot.slane %v395_v56, %v474_v53 }
 0x2d2   :  { %v480_v59 = vmul.f32 %v475_v55, %v787_v57 }
 0x2d3   :  { %v481_v61 = vmul.f32 %v479_v58, %v792_v60  ;;  %v467_v62 = vpop.f32.mrb[6].mxu0 }
 0x2d4   :  { %v485_v63 = vrot.slane %v467_v62, %v474_v53  ;;  %v469_v0 = vpop.f32.mrb[7].mxu0 }
 0x2d5   :  { %v489_v1 = vrot.slane %v469_v0, %v474_v53 }
 0x2d6   :  { %v490_v2 = vadd.f32 %v485_v63, %v480_v59 }
 0x2d7   :  { %v491_v3 = vadd.f32 %v489_v1, %v481_v61 }
 0x2d8   :  { %v492_v4 = vmax.f32 %v490_v2, 0.0 }
 0x2d9   :  { %v493_v5 = vmax.f32 %v491_v3, 0.0 }
 0x2db   :  { %v496_v6 = vcombine.low %v492_v4, %v493_v5 }
 0x2dd   :  { %515 = vst.sshfl [vmem:[%s828_s6] sm:$0x33 pattern:$0x76325410] %v496_v6 }
 0x2de   :  { %510 = vsyncpa [#allocation3], 1 }
 0x2df   :  { %511 = vsyncpa [#allocation5], 1 }

// kernel: _lambda_.4
= control target key start
LH: loop header
LB: loop body
LE: loop exit
PB: predicated region body
PF: predicated region fallthrough
CT: control target
= control target key end

     0   :  { %v558_v0 = vmov 0   ;;  %vm63_vm0 = vcmask 130048   ;;  %v559_v43 = vmov 0.0|0.0   ;;  %vm560_vm1 = vmmov 0   ;;  %s758_s1 = inlined_call_operand.vmem [shape: f32[144,32], index: 1, kind: input, shape index: {}]   ;;  %s759_s0 = inlined_call_operand.vmem [shape: f32[32,144], index: 0, kind: input, shape index: {}]   ;;  %s760_s2 = inlined_call_operand.vmem [shape: f32[32,8], index: 2, kind: input, shape index: {}]   ;;  %s761_s3 = inlined_call_operand.vmem [shape: f32[8,32], index: 3, kind: input, shape index: {}]   ;;  %s762_s4 = inlined_call_operand.vmem [shape: f32[1,8], index: 4, kind: input, shape index: {}]   ;;  %s763_s5 = inlined_call_operand.vmem [shape: f32[1,8], index: 5, kind: input, shape index: {}]   ;;  %s764_s6 = inlined_call_operand.vmem [shape: f32[32,32], index: 6, kind: output, shape index: {}]  }
   0x1   :  { %70 = vmatprep.subr.bf16.mxu0 %v558_v0  ;;  %v36_v1 = vld [vmem:[%s758_s1] sm:$0xff]  ;;  %v37_v2 = vld [vmem:[%s758_s1 + $0x8] sm:$0xff]  ;;  %v38_v3 = vld [vmem:[%s758_s1 + $0x10] sm:$0xff]  ;;  %540 = vmatprep.subr.bf16.mxu1 %v559_v43  ;;  %v561_v47 = vmov 0.0   ;;  %vm119_vm2 = vcmask 261120   ;;  %vm313_vm3 = vcmask 64512  }
   0x2   :  { %v54_v4 = vpack.c.bf16 %v37_v2, %v36_v1  ;;  %v39_v5 = vld [vmem:[%s758_s1 + $0x18] sm:$0xff]  ;;  %v40_v7 = vld [vmem:[%s758_s1 + $0x20] sm:$0xff]  ;;  %v41_v8 = vld [vmem:[%s758_s1 + $0x28] sm:$0xff]  ;;  %516 = vmatprep.mubr.msk.f32.mxu1 %vm560_vm1, %v561_v47 }
   0x3   :  { %v55_v6 = vpack.c.bf16 %v39_v5, %v38_v3  ;;  %v25_v9 = vld [vmem:[%s759_s0 + $0x8] sm:$0xff]  ;;  %v27_v10 = vld [vmem:[%s759_s0 + $0x18] sm:$0xff]  ;;  %v56_v11 = vpack.c.bf16 %v41_v8, %v40_v7  ;;  %v42_v13 = vld [vmem:[%s758_s1 + $0x30] sm:$0xff] }
   0x4   :  { %71 = vmatpush1.bf16.msra.mxu0 %v54_v4  ;;  %v33_v12 = vpack.c.bf16 %v27_v10, %v25_v9  ;;  %v43_v14 = vld [vmem:[%s758_s1 + $0x38] sm:$0xff]  ;;  %v44_v16 = vld [vmem:[%s758_s1 + $0x40] sm:$0xff]  ;;  %v45_v17 = vld [vmem:[%s758_s1 + $0x48] sm:$0xff] }
   0x5   :  { %72 = vmatprep.subr.bf16.mxu0 %v558_v0  ;;  %v57_v15 = vpack.c.bf16 %v43_v14, %v42_v13  ;;  %v58_v18 = vpack.c.bf16 %v45_v17, %v44_v16  ;;  %v46_v19 = vld [vmem:[%s758_s1 + $0x50] sm:$0xff]  ;;  %v47_v20 = vld [vmem:[%s758_s1 + $0x58] sm:$0xff]  ;;  %v48_v22 = vld [vmem:[%s758_s1 + $0x60] sm:$0xff] }
   0x6   :  { %488 = vmatprep.mubr.msk.bf16.mxu0 %vm63_vm0, %v33_v12  ;;  %v59_v21 = vpack.c.bf16 %v47_v20, %v46_v19  ;;  %v49_v23 = vld [vmem:[%s758_s1 + $0x68] sm:$0xff]  ;;  %v50_v25 = vld [vmem:[%s758_s1 + $0x70] sm:$0xff]  ;;  %v51_v26 = vld [vmem:[%s758_s1 + $0x78] sm:$0xff] }
   0x7   :  { %v60_v24 = vpack.c.bf16 %v49_v23, %v48_v22  ;;  %v61_v27 = vpack.c.bf16 %v51_v26, %v50_v25  ;;  %v52_v28 = vld [vmem:[%s758_s1 + $0x80] sm:$0xff]  ;;  %v53_v29 = vld [vmem:[%s758_s1 + $0x88] sm:$0xff]  ;;  %v26_v32 = vld [vmem:[%s759_s0 + $0x10] sm:$0xff] }
   0x8   :  { %73 = vmatpush1.bf16.msra.mxu0 %v55_v6  ;;  %v62_v30 = vpack.c.bf16 %v53_v29, %v52_v28  ;;  %v24_v31 = vld [vmem:[%s759_s0] sm:$0xff]  ;;  %v29_v33 = vld [vmem:[%s759_s0 + $0x28] sm:$0xff]  ;;  %v31_v34 = vld [vmem:[%s759_s0 + $0x38] sm:$0xff] }
   0x9   :  { %74 = vmatprep.subr.bf16.mxu0 %v558_v0  ;;  %v32_v35 = vpack.c.bf16 %v26_v32, %v24_v31  ;;  %v35_v36 = vpack.c.bf16 %v31_v34, %v29_v33  ;;  %v28_v37 = vld [vmem:[%s759_s0 + $0x20] sm:$0xff]  ;;  %v30_v38 = vld [vmem:[%s759_s0 + $0x30] sm:$0xff]  ;;  %v151_v41 = vld [vmem:[%s760_s2 + $0x8] sm:$0xff] }
   0xa   :  { %v34_v39 = vpack.c.bf16 %v30_v38, %v28_v37  ;;  %v150_v40 = vld [vmem:[%s760_s2] sm:$0xff]  ;;  %v152_v44 = vld [vmem:[%s760_s2 + $0x10] sm:$0xff]  ;;  %v153_v45 = vld [vmem:[%s760_s2 + $0x18] sm:$0xff]  ;;  %v460_v38 = vlaneseq }
   0xb   :  { %v541_v42 = vpack.c.bf16 %v151_v41, %v150_v40  ;;  %v544_v46 = vpack.c.bf16 %v153_v45, %v152_v44  ;;  %v312_v22 = vld [vmem:[%s761_s3] sm:$0xff] }
   0xc   :  { %75 = vmatpush1.bf16.msra.mxu0 %v56_v11  ;;  %v305_v32 = vld [vmem:[%s762_s4] sm:$0x1] }
   0xd   :  { %76 = vmatprep.subr.bf16.mxu0 %v558_v0  ;;  %542 = vmatpush3.bf16.msra.mxu1 %v541_v42 }
   0xe   :  { %543 = vmatprep.subr.bf16.mxu1 %v559_v43 }
  0x10   :  { %77 = vmatpush1.bf16.msra.mxu0 %v57_v15 }
  0x11   :  { %78 = vmatprep.subr.bf16.mxu0 %v558_v0  ;;  %545 = vmatpush3.bf16.msra.mxu1 %v544_v46 }
  0x12   :  { %546 = vmatprep.subr.bf16.mxu1 %v559_v43 }
  0x14   :  { %79 = vmatpush1.bf16.msra.mxu0 %v58_v18 }
  0x15   :  { %80 = vmatprep.subr.bf16.mxu0 %v558_v0 }
  0x18   :  { %81 = vmatpush1.bf16.msra.mxu0 %v59_v21 }
  0x19   :  { %82 = vmatprep.subr.bf16.mxu0 %v558_v0 }
  0x1c   :  { %83 = vmatpush1.bf16.msra.mxu0 %v60_v24 }
  0x1d   :  { %84 = vmatprep.subr.bf16.mxu0 %v558_v0 }
  0x20   :  { %85 = vmatpush1.bf16.msra.mxu0 %v61_v27 }
  0x21   :  { %86 = vmatprep.subr.bf16.mxu0 %v558_v0 }
  0x24   :  { %87 = vmatpush1.bf16.msra.mxu0 %v62_v30 }
  0x27   :  { %103 = vmatmul.mubr.bf16.vlgmr.msra.gmra.mrb[0].mxu0 %v32_v35  ;;  %v309_v35 = vld [vmem:[%s763_s5] sm:$0x1] }
  0x28   :  { %489 = vmatprep.mubr.msk.bf16.mxu0 %vm63_vm0, %v35_v36 }
  0x2f   :  { %111 = vmatmul.mubr.bf16.gmra.mrb[4].mxu0 %v34_v39  ;;  %v461_v39 = vshrl.u32 %v460_v38, 7 }
  0x31   :  { %v462_v40 = vsub.s32 0, %v461_v39 }
  0xfa   :  { %v691_v48 = vpop.f32.mrb[0].mxu0 }
  0xfb   :  { %v133_v49 = vmul.f32 %v691_v48, %v691_v48  ;;  %v106_v50 = vpop.f32.mrb[1].mxu0  ;;  %v120_v52 = vsel %vm119_vm2, %v691_v48, 0.0 }
  0xfc   :  { %v695_v51 = vpop.f32.mrb[2].mxu0 }
  0xfd   :  { %v121_v53 = vsel %vm119_vm2, %v695_v51, 0.0  ;;  %v134_v54 = vmul.f32 %v695_v51, %v695_v51  ;;  %v109_v55 = vpop.f32.mrb[3].mxu0  ;;  %v137_v57 = vsel %vm119_vm2, %v133_v49, 0.0 }
  0xfe   :  { %v122_v56 = vadd.f32 %v121_v53, %v120_v52 }
  0xff   :  { %v138_v58 = vsel %vm119_vm2, %v134_v54, 0.0 }
 0x100   :  { %v139_v59 = vadd.f32 %v138_v58, %v137_v57 }
 0x102   :  { %v705_v60 = vpop.f32.mrb[4].mxu0 }
 0x103   :  { %v123_v61 = vsel %vm119_vm2, %v705_v60, 0.0  ;;  %v135_v62 = vmul.f32 %v705_v60, %v705_v60  ;;  %v114_v63 = vpop.f32.mrb[5].mxu0 }
 0x104   :  { %v124_v0 = vadd.f32 %v123_v61, %v122_v56  ;;  %v711_v1 = vpop.f32.mrb[6].mxu0 }
 0x105   :  { %v140_v2 = vsel %vm119_vm2, %v135_v62, 0.0  ;;  %v125_v3 = vsel %vm119_vm2, %v711_v1, 0.0  ;;  %v136_v4 = vmul.f32 %v711_v1, %v711_v1  ;;  %v117_v5 = vpop.f32.mrb[7].mxu0 }
 0x106   :  { %v141_v6 = vadd.f32 %v140_v2, %v139_v59  ;;  %v126_v7 = vadd.f32 %v125_v3, %v124_v0 }
 0x107   :  { %v142_v8 = vsel %vm119_vm2, %v136_v4, 0.0 }
 0x108   :  { %v127_v9 = vrot.slane %v126_v7, 4  ;;  %v143_v10 = vadd.f32 %v142_v8, %v141_v6 }
 0x10a   :  { %v128_v11 = vadd.f32 %v127_v9, %v126_v7  ;;  %v144_v12 = vrot.slane %v143_v10, 4 }
 0x10c   :  { %v129_v13 = vrot.slane %v128_v11, 2  ;;  %v145_v14 = vadd.f32 %v144_v12, %v143_v10 }
 0x10e   :  { %v130_v15 = vadd.f32 %v129_v13, %v128_v11  ;;  %v146_v16 = vrot.slane %v145_v14, 2 }
 0x110   :  { %v131_v17 = vrot.slane %v130_v15, 1  ;;  %v147_v18 = vadd.f32 %v146_v16, %v145_v14 }
 0x112   :  { %v132_v19 = vadd.f32 %v131_v17, %v130_v15  ;;  %v148_v20 = vrot.slane %v147_v18, 1 }
 0x114   :  { %517 = vmatmul.mubr.msk.f32.vlgmr.msra.gmra.mrb[0].mxu1 %vm119_vm2, %v132_v19  ;;  %v149_v21 = vadd.f32 %v148_v20, %v147_v18 }
 0x115   :  { %548 = vmatpush3.bf16.msra.mxu1 %v541_v42  ;;  %527 = vmatprep.mubr.msk.f32.mxu1 %vm560_vm1, %v561_v47 }
 0x116   :  { %549 = vmatprep.subr.bf16.mxu1 %v559_v43 }
 0x119   :  { %551 = vmatpush3.bf16.msra.mxu1 %v544_v46 }
 0x11a   :  { %530 = vmatprep.subr.mxu1 %v561_v47 }
 0x11c   :  { %528 = vmatmul.mubr.msk.f32.vlgmr.msra.gmra.mrb[2].mxu1 %vm119_vm2, %v149_v21 }
 0x11d   :  { %532 = vmatprep.mubr.msk.f32.mxu1 %vm560_vm1, %v561_v47  ;;  %531 = vmatpush3.msra.mxu1 %v312_v22 }
 0x11e   :  { %535 = vmatprep.subr.mxu1 %v561_v47 }
 0x1e7   :  { %v223_v23 = vpop.f32.mrb[0].mxu1 }
 0x1e8   :  { %v518_v24 = vpop.f32.mrb[1].mxu1  ;;  %v228_v25 = vmul.f32 0.0078125, %v223_v23 }
 0x1ea   :  { %v303_v27 = vmul.f32 %v228_v25, %v228_v25 }
 0x1ef   :  { %v298_v26 = vpop.f32.mrb[2].mxu1 }
 0x1f0   :  { %v302_v28 = vmul.f32 0.0078125, %v298_v26  ;;  %v529_v29 = vpop.f32.mrb[3].mxu1 }
 0x1f2   :  { %v304_v30 = vsub.f32 %v302_v28, %v303_v27 }
 0x1f4   :  { %v306_v31 = vadd.f32 1e-05, %v304_v30 }
 0x1f6   :  { %556 = vrsqrt.f32 %v306_v31 }
 0x200   :  { %v557_v33 = vpop.eup %556 }
 0x201   :  { %v308_v34 = vmul.f32 %v557_v33, %v305_v32 }
 0x203   :  { %533 = vmatmul.mubr.msk.f32.vlgmr.msra.gmra.mrb[4].mxu1 %vm313_vm3, %v308_v34  ;;  %v310_v36 = vmul.f32 %v308_v34, %v228_v25 }
 0x204   :  { %536 = vmatpush3.msra.mxu1 %v312_v22  ;;  %537 = vmatprep.mubr.msk.f32.mxu1 %vm560_vm1, %v561_v47 }
 0x205   :  { %v311_v37 = vsub.f32 %v309_v35, %v310_v36 }
 0x207   :  { %538 = vmatmul.mubr.msk.f32.vlgmr.msra.gmra.mrb[6].mxu1 %vm313_vm3, %v311_v37 }
 0x2d6   :  { %v383_v41 = vpop.f32.mrb[4].mxu1 }
 0x2d7   :  { %v463_v42 = vrot.slane %v383_v41, %v462_v40  ;;  %v534_v43 = vpop.f32.mrb[5].mxu1 }
 0x2d9   :  { %v464_v44 = vmul.f32 %v463_v42, %v691_v48  ;;  %v465_v45 = vmul.f32 %v463_v42, %v695_v51  ;;  %v466_v46 = vmul.f32 %v463_v42, %v705_v60  ;;  %v467_v49 = vmul.f32 %v463_v42, %v711_v1 }
 0x2da   :  { %v456_v50 = vpop.f32.mrb[6].mxu1 }
 0x2db   :  { %v471_v52 = vrot.slane %v456_v50, %v462_v40  ;;  %v539_v53 = vpop.f32.mrb[7].mxu1 }
 0x2dd   :  { %v472_v47 = vadd.f32 %v471_v52, %v464_v44  ;;  %v473_v54 = vadd.f32 %v471_v52, %v465_v45  ;;  %v474_v55 = vadd.f32 %v471_v52, %v466_v46  ;;  %v475_v56 = vadd.f32 %v471_v52, %v467_v49 }
 0x2df   :  { %v476_v57 = vmax.f32 %v472_v47, 0.0  ;;  %v477_v58 = vmax.f32 %v473_v54, 0.0  ;;  %v478_v59 = vmax.f32 %v474_v55, 0.0  ;;  %v479_v61 = vmax.f32 %v475_v56, 0.0 }
 0x2e1   :  { %480 = vst.msk [vmem:[%s764_s6] sm:$0xff] %vm119_vm2, %v476_v57  ;;  %481 = vst.msk [vmem:[%s764_s6 + $0x8] sm:$0xff] %vm119_vm2, %v477_v58 }
 0x2e2   :  { %482 = vst.msk [vmem:[%s764_s6 + $0x10] sm:$0xff] %vm119_vm2, %v478_v59  ;;  %483 = vst.msk [vmem:[%s764_s6 + $0x18] sm:$0xff] %vm119_vm2, %v479_v61 }

// kernel: _lambda_.5
= control target key start
LH: loop header
LB: loop body
LE: loop exit
PB: predicated region body
PF: predicated region fallthrough
CT: control target
= control target key end

     0   :  { %vm60_vm0 = vcmask 588800   ;;  %vm85_vm1 = vcmask 1043456   ;;  %vm202_vm2 = vcmask 97280   ;;  %s485_s1 = inlined_call_operand.vmem [shape: f32[72,12], index: 1, kind: input, shape index: {}]   ;;  %s486_s0 = inlined_call_operand.vmem [shape: f32[128,72], index: 0, kind: input, shape index: {}]   ;;  %s487_s2 = inlined_call_operand.vmem [shape: f32[1,12], index: 2, kind: input, shape index: {}]   ;;  %s488_s3 = inlined_call_operand.vmem [shape: f32[128,12], index: 3, kind: output, shape index: {}]  }
   0x1   :  { %v39_v0 = vld [vmem:[%s485_s1] sm:$0xff]  ;;  %v40_v1 = vld [vmem:[%s485_s1 + $0x8] sm:$0xff]  ;;  %v41_v2 = vld [vmem:[%s485_s1 + $0x10] sm:$0xff] }
   0x2   :  { %v48_v3 = vpack.c.bf16 %v40_v1, %v39_v0  ;;  %v42_v4 = vld [vmem:[%s485_s1 + $0x18] sm:$0xff]  ;;  %v43_v6 = vld [vmem:[%s485_s1 + $0x20] sm:$0xff]  ;;  %v44_v7 = vld [vmem:[%s485_s1 + $0x28] sm:$0xff] }
   0x3   :  { %v49_v5 = vpack.c.bf16 %v42_v4, %v41_v2  ;;  %v15_v8 = vld [vmem:[%s486_s0] sm:$0xff]  ;;  %v16_v9 = vld [vmem:[%s486_s0 + $0x8] sm:$0xff]  ;;  %v50_v13 = vpack.c.bf16 %v44_v7, %v43_v6  ;;  %v45_v15 = vld [vmem:[%s485_s1 + $0x30] sm:$0xff] }
   0x4   :  { %245 = vmatprep.subr.bf16.mxu0 %v48_v3  ;;  %271 = vmatprep.subr.bf16.mxu1 %v48_v3  ;;  %v23_v10 = vld [vmem:[%s486_s0 + $0x40] sm:$0xff]  ;;  %v31_v11 = vpack.c.bf16 %v16_v9, %v15_v8  ;;  %v24_v12 = vld [vmem:[%s486_s0 + $0x48] sm:$0xff]  ;;  %v46_v16 = vld [vmem:[%s485_s1 + $0x38] sm:$0xff] }
   0x5   :  { %246 = vmatpush3.bf16.msra.mxu0 %v48_v3  ;;  %276 = vmatpush3.bf16.msra.mxu1 %v48_v3  ;;  %v35_v14 = vpack.c.bf16 %v24_v12, %v23_v10  ;;  %v51_v17 = vpack.c.bf16 %v46_v16, %v45_v15  ;;  %v47_v18 = vld [vmem:[%s485_s1 + $0x40] sm:$0xff]  ;;  %v17_v20 = vld [vmem:[%s486_s0 + $0x10] sm:$0xff]  ;;  %v18_v21 = vld [vmem:[%s486_s0 + $0x18] sm:$0xff] }
   0x6   :  { %247 = vmatprep.subr.bf16.mxu0 %v49_v5  ;;  %272 = vmatprep.subr.bf16.mxu1 %v49_v5  ;;  %v52_v19 = vpack.c.bf16 %v47_v18, %v47_v18  ;;  %v25_v22 = vld [vmem:[%s486_s0 + $0x50] sm:$0xff]  ;;  %v26_v23 = vld [vmem:[%s486_s0 + $0x58] sm:$0xff]  ;;  %v19_v24 = vld [vmem:[%s486_s0 + $0x20] sm:$0xff]  ;;  %v32_v29 = vpack.c.bf16 %v18_v21, %v17_v20 }
   0x7   :  { %255 = vmatprep.mubr.msk.bf16.mxu0 %vm60_vm0, %v31_v11  ;;  %263 = vmatprep.mubr.msk.bf16.mxu1 %vm60_vm0, %v35_v14  ;;  %v20_v26 = vld [vmem:[%s486_s0 + $0x28] sm:$0xff]  ;;  %v27_v27 = vld [vmem:[%s486_s0 + $0x60] sm:$0xff]  ;;  %v36_v30 = vpack.c.bf16 %v26_v23, %v25_v22  ;;  %v21_v33 = vld [vmem:[%s486_s0 + $0x30] sm:$0xff] }
   0x8   :  { %v87_v25 = vsel %vm85_vm1, %v52_v19, 0  ;;  %v28_v28 = vld [vmem:[%s486_s0 + $0x68] sm:$0xff]  ;;  %v33_v31 = vpack.c.bf16 %v20_v26, %v19_v24  ;;  %v22_v34 = vld [vmem:[%s486_s0 + $0x38] sm:$0xff]  ;;  %v29_v35 = vld [vmem:[%s486_s0 + $0x70] sm:$0xff] }
   0x9   :  { %248 = vmatpush3.bf16.msra.mxu0 %v49_v5  ;;  %277 = vmatpush3.bf16.msra.mxu1 %v49_v5  ;;  %v37_v32 = vpack.c.bf16 %v28_v28, %v27_v27  ;;  %v30_v36 = vld [vmem:[%s486_s0 + $0x78] sm:$0xff]  ;;  %v34_v37 = vpack.c.bf16 %v22_v34, %v21_v33  ;;  %v223_v39 = vld [vmem:[%s487_s2] ss:$0 sm:$0xff] }
   0xa   :  { %249 = vmatprep.subr.bf16.mxu0 %v50_v13  ;;  %273 = vmatprep.subr.bf16.mxu1 %v50_v13  ;;  %v38_v38 = vpack.c.bf16 %v30_v36, %v29_v35 }
   0xd   :  { %250 = vmatpush3.bf16.msra.mxu0 %v50_v13  ;;  %278 = vmatpush3.bf16.msra.mxu1 %v50_v13 }
   0xe   :  { %251 = vmatprep.subr.bf16.mxu0 %v51_v17  ;;  %274 = vmatprep.subr.bf16.mxu1 %v51_v17 }
  0x11   :  { %252 = vmatpush3.bf16.msra.mxu0 %v51_v17  ;;  %279 = vmatpush3.bf16.msra.mxu1 %v51_v17 }
  0x12   :  { %281 = vmatprep.subr.msk.bf16.mxu0 %vm85_vm1, %v52_v19  ;;  %282 = vmatprep.subr.msk.bf16.mxu1 %vm85_vm1, %v52_v19 }
  0x15   :  { %254 = vmatpush3.bf16.msra.mxu0 %v87_v25  ;;  %280 = vmatpush3.bf16.msra.mxu1 %v87_v25 }
  0x18   :  { %256 = vmatmul.mubr.msk.bf16.vlgmr.msra.gmra.mrb[0].mxu0 %vm60_vm0, %v32_v29  ;;  %264 = vmatmul.mubr.msk.bf16.vlgmr.msra.gmra.mrb[0].mxu1 %vm60_vm0, %v36_v30 }
  0x19   :  { %259 = vmatprep.mubr.msk.bf16.mxu0 %vm60_vm0, %v33_v31  ;;  %267 = vmatprep.mubr.msk.bf16.mxu1 %vm60_vm0, %v37_v32 }
  0x20   :  { %260 = vmatmul.mubr.msk.bf16.gmra.mrb[4].mxu0 %vm60_vm0, %v34_v37  ;;  %268 = vmatmul.mubr.msk.bf16.gmra.mrb[4].mxu1 %vm60_vm0, %v38_v38 }
  0xeb   :  { %v257_v40 = vpop.f32.mrb[0].mxu0  ;;  %v265_v41 = vpop.f32.mrb[0].mxu1 }
  0xec   :  { %v132_v42 = vadd.f32 %v257_v40, %v223_v39  ;;  %v164_v43 = vadd.f32 %v265_v41, %v223_v39  ;;  %v123_v44 = vpop.f32.mrb[1].mxu0  ;;  %v155_v45 = vpop.f32.mrb[1].mxu1 }
  0xed   :  { %v124_v46 = vadd.f32 %v223_v39, %v123_v44  ;;  %v156_v47 = vadd.f32 %v223_v39, %v155_v45  ;;  %v258_v48 = vpop.f32.mrb[2].mxu0  ;;  %v266_v49 = vpop.f32.mrb[2].mxu1 }
  0xee   :  { %283 = vtanh.f32 %v132_v42  ;;  %v135_v50 = vadd.f32 %v258_v48, %v223_v39  ;;  %v126_v51 = vpop.f32.mrb[3].mxu0  ;;  %v158_v52 = vpop.f32.mrb[3].mxu1  ;;  %v167_v53 = vadd.f32 %v266_v49, %v223_v39 }
  0xef   :  { %285 = vtanh.f32 %v164_v43  ;;  %v127_v54 = vadd.f32 %v223_v39, %v126_v51  ;;  %v159_v55 = vadd.f32 %v223_v39, %v158_v52 }
  0xf0   :  { %287 = vtanh.f32 %v124_v46 }
  0xf1   :  { %289 = vtanh.f32 %v156_v47 }
  0xf2   :  { %291 = vtanh.f32 %v135_v50 }
  0xf3   :  { %293 = vtanh.f32 %v167_v53  ;;  %v261_v56 = vpop.f32.mrb[4].mxu0  ;;  %v269_v57 = vpop.f32.mrb[4].mxu1 }
  0xf4   :  { %295 = vtanh.f32 %v127_v54  ;;  %v148_v58 = vadd.f32 %v261_v56, %v223_v39  ;;  %v180_v59 = vadd.f32 %v269_v57, %v223_v39  ;;  %v139_v60 = vpop.f32.mrb[5].mxu0  ;;  %v171_v61 = vpop.f32.mrb[5].mxu1 }
  0xf5   :  { %297 = vtanh.f32 %v159_v55  ;;  %v140_v62 = vadd.f32 %v223_v39, %v139_v60  ;;  %v172_v63 = vadd.f32 %v223_v39, %v171_v61  ;;  %v262_v0 = vpop.f32.mrb[6].mxu0  ;;  %v270_v1 = vpop.f32.mrb[6].mxu1 }
  0xf6   :  { %299 = vtanh.f32 %v148_v58  ;;  %v151_v2 = vadd.f32 %v262_v0, %v223_v39  ;;  %v142_v3 = vpop.f32.mrb[7].mxu0  ;;  %v174_v4 = vpop.f32.mrb[7].mxu1  ;;  %v183_v5 = vadd.f32 %v270_v1, %v223_v39 }
  0xf7   :  { %301 = vtanh.f32 %v180_v59  ;;  %v143_v7 = vadd.f32 %v223_v39, %v142_v3  ;;  %v175_v9 = vadd.f32 %v223_v39, %v174_v4 }
  0xf8   :  { %v284_v6 = vpop.eup %283  ;;  %303 = vtanh.f32 %v140_v62 }
  0xf9   :  { %v286_v8 = vpop.eup %285  ;;  %205 = vst.msk [vmem:[%s488_s3 + $0x10] sm:$0xff] %vm202_vm2, %v284_v6  ;;  %305 = vtanh.f32 %v172_v63 }
  0xfa   :  { %v288_v10 = vpop.eup %287  ;;  %213 = vst.msk [vmem:[%s488_s3 + $0x50] sm:$0xff] %vm202_vm2, %v286_v8  ;;  %307 = vtanh.f32 %v151_v2 }
  0xfb   :  { %v290_v11 = vpop.eup %289  ;;  %203 = vst.msk [vmem:[%s488_s3] sm:$0xff] %vm202_vm2, %v288_v10  ;;  %309 = vtanh.f32 %v183_v5 }
  0xfc   :  { %v292_v12 = vpop.eup %291  ;;  %211 = vst.msk [vmem:[%s488_s3 + $0x40] sm:$0xff] %vm202_vm2, %v290_v11  ;;  %311 = vtanh.f32 %v143_v7 }
  0xfd   :  { %v294_v13 = vpop.eup %293  ;;  %206 = vst.msk [vmem:[%s488_s3 + $0x18] sm:$0xff] %vm202_vm2, %v292_v12  ;;  %313 = vtanh.f32 %v175_v9 }
  0xfe   :  { %v296_v14 = vpop.eup %295  ;;  %214 = vst.msk [vmem:[%s488_s3 + $0x58] sm:$0xff] %vm202_vm2, %v294_v13 }
  0xff   :  { %v298_v15 = vpop.eup %297  ;;  %204 = vst.msk [vmem:[%s488_s3 + $0x8] sm:$0xff] %vm202_vm2, %v296_v14 }
 0x100   :  { %v300_v16 = vpop.eup %299  ;;  %212 = vst.msk [vmem:[%s488_s3 + $0x48] sm:$0xff] %vm202_vm2, %v298_v15 }
 0x101   :  { %v302_v17 = vpop.eup %301  ;;  %209 = vst.msk [vmem:[%s488_s3 + $0x30] sm:$0xff] %vm202_vm2, %v300_v16 }
 0x102   :  { %v304_v18 = vpop.eup %303  ;;  %217 = vst.msk [vmem:[%s488_s3 + $0x70] sm:$0xff] %vm202_vm2, %v302_v17 }
 0x103   :  { %v306_v19 = vpop.eup %305  ;;  %207 = vst.msk [vmem:[%s488_s3 + $0x20] sm:$0xff] %vm202_vm2, %v304_v18 }
 0x104   :  { %v308_v20 = vpop.eup %307  ;;  %215 = vst.msk [vmem:[%s488_s3 + $0x60] sm:$0xff] %vm202_vm2, %v306_v19 }
 0x105   :  { %v310_v21 = vpop.eup %309  ;;  %210 = vst.msk [vmem:[%s488_s3 + $0x38] sm:$0xff] %vm202_vm2, %v308_v20 }
 0x106   :  { %v312_v22 = vpop.eup %311  ;;  %218 = vst.msk [vmem:[%s488_s3 + $0x78] sm:$0xff] %vm202_vm2, %v310_v21 }
 0x107   :  { %v314_v23 = vpop.eup %313  ;;  %208 = vst.msk [vmem:[%s488_s3 + $0x28] sm:$0xff] %vm202_vm2, %v312_v22 }
 0x108   :  { %216 = vst.msk [vmem:[%s488_s3 + $0x68] sm:$0xff] %vm202_vm2, %v314_v23 }

</bundles_post_ra>
